<compile_context>
chip_gen: v5e
topology: v5e:2x2
jax: 0.10.0
libtpu: 0.0.40
codegen_flags: <defaults>
</compile_context>

<pallas_src>
import math

import jax
import jax.numpy as jnp
import numpy as np
from jax.experimental import pallas as pl
from jax.experimental.pallas import tpu as pltpu


# ---------------------------------------------------------------------------
# Kernel 1: embedding row gather + FM bi-interaction + FeaturesLinear sum.
# ---------------------------------------------------------------------------
def _make_gather_fm_kernel(num_fields, embed_dim):
    nf = num_fields

    def kernel(x_ref, off_ref, *refs):
        # x_ref:  (B, F) int32 in SMEM (scalar prefetch), consumed by index_maps
        # off_ref:(F,)   int32 in SMEM (scalar prefetch)
        # refs[:nf]      : gathered embedding rows, each (1, 1, D) f32
        # refs[nf:2*nf]  : gathered linear-table rows, each (1, 1, 1) f32
        # refs[2*nf]     : cross-term output block (1, 1, D)
        # refs[2*nf + 1] : linear-term output block (1, 1, 1)
        del x_ref, off_ref
        emb_refs = refs[:nf]
        fc_refs = refs[nf:2 * nf]
        cross_ref = refs[2 * nf]
        lin_ref = refs[2 * nf + 1]

        s = jnp.zeros((1, embed_dim), jnp.float32)
        sq = jnp.zeros((1, embed_dim), jnp.float32)
        for r in emb_refs:
            e = r[0]                       # (1, D)
            s = s + e
            sq = sq + e * e
        cross_ref[0] = 0.5 * (s * s - sq)  # FM bi-interaction (no reduce_sum)

        lin = jnp.zeros((1, 1), jnp.float32)
        for r in fc_refs:
            lin = lin + r[0]               # (1, 1)
        lin_ref[0] = lin

    return kernel


def _row_index_map(field, vocab):
    """Data-dependent row gather index_map for one field."""
    def imap(i, x_ref, off_ref):
        row = x_ref[i, field] + off_ref[field]
        # Clamp so an out-of-range index can never become an OOB DMA.
        row = jnp.minimum(jnp.maximum(row, 0), vocab - 1)
        return (row, 0, 0)
    return imap


def embedding_fm_linear(x, offsets, table, fc):
    """x: (B, F) int32, table: (V, D) f32, fc: (V, 1) f32.

    Returns:
      cross: (B, D) = 0.5 * ((sum_f e_f)^2 - sum_f e_f^2)
      lin:   (B, 1) = sum_f fc[row_f]   (FeaturesLinear without its bias)
    """
    b, f = x.shape
    v, d = table.shape
    # Gather along the leading dim; last two dims stay full -> valid blocks.
    table3 = table.reshape(v, 1, d)
    fc3 = fc.reshape(v, 1, 1)

    emb_specs = [pl.BlockSpec((1, 1, d), _row_index_map(j, v)) for j in range(f)]
    fc_specs = [pl.BlockSpec((1, 1, 1), _row_index_map(j, v)) for j in range(f)]
    out_specs = (
        pl.BlockSpec((1, 1, d), lambda i, x_ref, off_ref: (i, 0, 0)),
        pl.BlockSpec((1, 1, 1), lambda i, x_ref, off_ref: (i, 0, 0)),
    )
    out_shape = (
        jax.ShapeDtypeStruct((b, 1, d), jnp.float32),
        jax.ShapeDtypeStruct((b, 1, 1), jnp.float32),
    )

    cost = pl.CostEstimate(
        flops=6 * b * f * d,
        transcendentals=0,
        bytes_accessed=b * f * (d + 1) * 4 + b * (d + 1) * 4 + (b * f + f) * 4,
    )

    cross, lin = pl.pallas_call(
        _make_gather_fm_kernel(f, d),
        grid_spec=pltpu.PrefetchScalarGridSpec(
            num_scalar_prefetch=2,
            grid=(b,),
            in_specs=[*emb_specs, *fc_specs],
            out_specs=out_specs,
        ),
        out_shape=out_shape,
        compiler_params=pltpu.CompilerParams(
            dimension_semantics=("parallel",),        # 2x on v7x megacore
            vmem_limit_bytes=32 * 1024 * 1024,
        ),
        cost_estimate=cost,
    )(x.astype(jnp.int32), offsets.astype(jnp.int32),
      *([table3] * f), *([fc3] * f))

    return cross[:, 0, :], lin[:, 0, :]


# ---------------------------------------------------------------------------
# Kernel 2: BN(cross) + MLP + linear term + bias + sigmoid, batch-tiled.
# ---------------------------------------------------------------------------
def _bn_fold(gamma, beta, mean, var, eps=1e-5):
    scale = gamma / jnp.sqrt(var + eps)
    shift = beta - mean * scale
    return scale.reshape(1, -1), shift.reshape(1, -1)


def _full_spec(a):
    zeros = (0,) * a.ndim
    return pl.BlockSpec(a.shape, lambda i, z=zeros: z)


def _make_mlp_head_kernel(num_hidden):
    def kernel(cross_ref, lin_ref, bn0s_ref, bn0t_ref, *refs):
        # BatchNorm1d on the FM cross term (eval mode, folded scale/shift).
        h = cross_ref[...] * bn0s_ref[...] + bn0t_ref[...]
        # TODO(synk): Dropout layers are identity here (inference forward).
        p = 0
        for _ in range(num_hidden):
            w_ref, b_ref, s_ref, t_ref = refs[p], refs[p + 1], refs[p + 2], refs[p + 3]
            p += 4
            h = jnp.dot(h, w_ref[...], preferred_element_type=jnp.float32) + b_ref[...]
            h = h * s_ref[...] + t_ref[...]         # folded BatchNorm1d (eval)
            h = jnp.maximum(h, 0.0)                 # ReLU
        w_out_ref, b_out_ref, lin_bias_ref = refs[p], refs[p + 1], refs[p + 2]
        out_ref = refs[p + 3]
        z = jnp.dot(h, w_out_ref[...], preferred_element_type=jnp.float32) + b_out_ref[...]
        logit = z + lin_ref[...] + lin_bias_ref[...]
        out_ref[...] = 1.0 / (1.0 + jnp.exp(-logit))
    return kernel


def mlp_head(cross, lin, params, tb=8):
    b, d = cross.shape
    b_pad = ((b + tb - 1) // tb) * tb
    if b_pad != b:
        cross = jnp.pad(cross, ((0, b_pad - b), (0, 0)))
        lin = jnp.pad(lin, ((0, b_pad - b), (0, 0)))

    bn0_s, bn0_t = _bn_fold(**params["bn0"])
    weights = [bn0_s, bn0_t]
    for layer in params["hidden"]:
        s, t = _bn_fold(layer["gamma"], layer["beta"], layer["mean"], layer["var"])
        weights += [layer["w"], layer["b"].reshape(1, -1), s, t]
    weights += [params["w_out"], params["b_out"].reshape(1, 1),
                params["lin_bias"].reshape(1, 1)]

    in_specs = [pl.BlockSpec((tb, d), lambda i: (i, 0)),
                pl.BlockSpec((tb, 1), lambda i: (i, 0))]
    in_specs += [_full_spec(a) for a in weights]

    out = pl.pallas_call(
        _make_mlp_head_kernel(len(params["hidden"])),
        grid=(b_pad // tb,),
        in_specs=in_specs,
        out_specs=pl.BlockSpec((tb, 1), lambda i: (i, 0)),
        out_shape=jax.ShapeDtypeStruct((b_pad, 1), jnp.float32),
        compiler_params=pltpu.CompilerParams(
            dimension_semantics=("parallel",),
            vmem_limit_bytes=32 * 1024 * 1024,
        ),
    )(cross, lin, *weights)
    return out[:b, 0]


# ---------------------------------------------------------------------------
# Full model forward, params, and pure-JAX reference.
# ---------------------------------------------------------------------------
def nfm_forward(x, params):
    cross, lin = embedding_fm_linear(x, params["offsets"], params["table"], params["fc"])
    return mlp_head(cross, lin, params)


def nfm_reference(x, params):
    hp = jax.lax.Precision.HIGHEST
    idx = x + params["offsets"][None, :]
    emb = params["table"][idx]                                   # (B, F, D)
    sum_e = jnp.sum(emb, axis=1)
    cross = 0.5 * (sum_e * sum_e - jnp.sum(emb * emb, axis=1))   # (B, D)
    s0, t0 = _bn_fold(**params["bn0"])
    h = cross * s0 + t0
    for layer in params["hidden"]:
        s, t = _bn_fold(layer["gamma"], layer["beta"], layer["mean"], layer["var"])
        h = jnp.dot(h, layer["w"], precision=hp) + layer["b"][None, :]
        h = jnp.maximum(h * s + t, 0.0)
    z = jnp.dot(h, params["w_out"], precision=hp) + params["b_out"][None, :]
    lin = jnp.sum(params["fc"][idx][..., 0], axis=1, keepdims=True) \
        + params["lin_bias"][None, :]
    return jax.nn.sigmoid((z + lin)[:, 0])


def init_params(field_dims, embed_dim, mlp_dims, key):
    v = int(sum(field_dims))
    offsets = jnp.asarray(
        np.array((0, *np.cumsum(field_dims)[:-1]), dtype=np.int32))
    kit = iter(jax.random.split(key, 32))

    bound = math.sqrt(6.0 / (v + embed_dim))               # xavier_uniform
    table = jax.random.uniform(next(kit), (v, embed_dim), jnp.float32, -bound, bound)
    fc = jax.random.normal(next(kit), (v, 1), jnp.float32)
    lin_bias = jnp.zeros((1,), jnp.float32)                # torch init: zeros

    def bn_params(dim):
        return dict(
            gamma=1.0 + 0.1 * jax.random.normal(next(kit), (dim,), jnp.float32),
            beta=0.1 * jax.random.normal(next(kit), (dim,), jnp.float32),
            mean=0.05 * jax.random.normal(next(kit), (dim,), jnp.float32),
            var=1.0 + 0.1 * jax.random.uniform(next(kit), (dim,), jnp.float32),
        )

    bn0 = bn_params(embed_dim)

    hidden = []
    in_dim = embed_dim
    for hdim in mlp_dims:
        wb = math.sqrt(6.0 / (in_dim + hdim))
        w = jax.random.uniform(next(kit), (in_dim, hdim), jnp.float32, -wb, wb)
        bvec = 0.01 * jax.random.normal(next(kit), (hdim,), jnp.float32)
        hidden.append(dict(w=w, b=bvec, **bn_params(hdim)))
        in_dim = hdim

    wb = math.sqrt(6.0 / (in_dim + 1))
    w_out = jax.random.uniform(next(kit), (in_dim, 1), jnp.float32, -wb, wb)
    b_out = 0.01 * jax.random.normal(next(kit), (1,), jnp.float32)

    return dict(offsets=offsets, table=table, fc=fc, lin_bias=lin_bias,
                bn0=bn0, hidden=hidden, w_out=w_out, b_out=b_out)


if __name__ == "__main__":
    field_dims = (5, 7, 9, 11)    # sum = 32 vocabulary rows
    embed_dim = 32
    mlp_dims = (64, 32)
    dropouts = (0.2, 0.2)         # inference-time no-ops
    batch = 8
    num_fields = len(field_dims)

    key = jax.random.PRNGKey(0)
    k_params, k_x = jax.random.split(key)
    params = init_params(field_dims, embed_dim, mlp_dims, k_params)

    ks = jax.random.split(k_x, num_fields)
    x = jnp.concatenate(
        [jax.random.randint(ks[j], (batch, 1), 0, field_dims[j], dtype=jnp.int32)
         for j in range(num_fields)], axis=1)                 # (batch, num_fields)

    out = jax.jit(nfm_forward)(x, params)
    out = jax.block_until_ready(out)

    ref = nfm_reference(x, params)
    assert out.shape == (batch,)
    np.testing.assert_allclose(np.asarray(out), np.asarray(ref),
                               rtol=1e-4, atol=1e-5)

    print("KERNEL_OK")
</pallas_src>

<mosaic_0001>
module attributes {stable_mosaic.version = 11 : i64} {
  func.func @kernel(%arg0: i32, %arg1: memref<8x32xf32, #tpu.memory_space<vmem>>, %arg2: memref<8x1xf32, #tpu.memory_space<vmem>>, %arg3: memref<1x32xf32, #tpu.memory_space<vmem>>, %arg4: memref<1x32xf32, #tpu.memory_space<vmem>>, %arg5: memref<32x64xf32, #tpu.memory_space<vmem>>, %arg6: memref<1x64xf32, #tpu.memory_space<vmem>>, %arg7: memref<1x64xf32, #tpu.memory_space<vmem>>, %arg8: memref<1x64xf32, #tpu.memory_space<vmem>>, %arg9: memref<64x32xf32, #tpu.memory_space<vmem>>, %arg10: memref<1x32xf32, #tpu.memory_space<vmem>>, %arg11: memref<1x32xf32, #tpu.memory_space<vmem>>, %arg12: memref<1x32xf32, #tpu.memory_space<vmem>>, %arg13: memref<32x1xf32, #tpu.memory_space<vmem>>, %arg14: memref<1x1xf32, #tpu.memory_space<vmem>>, %arg15: memref<1x1xf32, #tpu.memory_space<vmem>>, %arg16: memref<8x1xf32, #tpu.memory_space<vmem>>) attributes {dimension_semantics = [#tpu.dimension_semantics<parallel>], iteration_bounds = array<i64: 1>, scalar_prefetch = 0 : i64, scratch_operands = 0 : i64, tpu.core_type = #tpu.core_type<tc>, window_params = [{transform_indices = @transform_0, window_bounds = array<i64: 8, 32>}, {transform_indices = @transform_1, window_bounds = array<i64: 8, 1>}, {pipeline_mode = #tpu.pipeline_mode<synchronous>, transform_indices = @transform_2, window_bounds = array<i64: 1, 32>}, {pipeline_mode = #tpu.pipeline_mode<synchronous>, transform_indices = @transform_3, window_bounds = array<i64: 1, 32>}, {pipeline_mode = #tpu.pipeline_mode<synchronous>, transform_indices = @transform_4, window_bounds = array<i64: 32, 64>}, {pipeline_mode = #tpu.pipeline_mode<synchronous>, transform_indices = @transform_5, window_bounds = array<i64: 1, 64>}, {pipeline_mode = #tpu.pipeline_mode<synchronous>, transform_indices = @transform_6, window_bounds = array<i64: 1, 64>}, {pipeline_mode = #tpu.pipeline_mode<synchronous>, transform_indices = @transform_7, window_bounds = array<i64: 1, 64>}, {pipeline_mode = #tpu.pipeline_mode<synchronous>, transform_indices = @transform_8, window_bounds = array<i64: 64, 32>}, {pipeline_mode = #tpu.pipeline_mode<synchronous>, transform_indices = @transform_9, window_bounds = array<i64: 1, 32>}, {pipeline_mode = #tpu.pipeline_mode<synchronous>, transform_indices = @transform_10, window_bounds = array<i64: 1, 32>}, {pipeline_mode = #tpu.pipeline_mode<synchronous>, transform_indices = @transform_11, window_bounds = array<i64: 1, 32>}, {pipeline_mode = #tpu.pipeline_mode<synchronous>, transform_indices = @transform_12, window_bounds = array<i64: 32, 1>}, {pipeline_mode = #tpu.pipeline_mode<synchronous>, transform_indices = @transform_13, window_bounds = array<i64: 1, 1>}, {pipeline_mode = #tpu.pipeline_mode<synchronous>, transform_indices = @transform_14, window_bounds = array<i64: 1, 1>}, {transform_indices = @transform_15, window_bounds = array<i64: 8, 1>}]} {
    %c0 = arith.constant 0 : index
    %c0_0 = arith.constant 0 : index
    %0 = vector.load %arg1[%c0, %c0_0] : memref<8x32xf32, #tpu.memory_space<vmem>>, vector<8x32xf32>
    %c0_1 = arith.constant 0 : index
    %c0_2 = arith.constant 0 : index
    %1 = vector.load %arg3[%c0_1, %c0_2] : memref<1x32xf32, #tpu.memory_space<vmem>>, vector<1x32xf32>
    %2 = vector.broadcast %1 : vector<1x32xf32> to vector<8x32xf32>
    %3 = arith.mulf %0, %2 : vector<8x32xf32>
    %c0_3 = arith.constant 0 : index
    %c0_4 = arith.constant 0 : index
    %4 = vector.load %arg4[%c0_3, %c0_4] : memref<1x32xf32, #tpu.memory_space<vmem>>, vector<1x32xf32>
    %5 = vector.broadcast %4 : vector<1x32xf32> to vector<8x32xf32>
    %6 = arith.addf %3, %5 : vector<8x32xf32>
    %c0_5 = arith.constant 0 : index
    %c0_6 = arith.constant 0 : index
    %7 = vector.load %arg5[%c0_5, %c0_6] : memref<32x64xf32, #tpu.memory_space<vmem>>, vector<32x64xf32>
    %cst = arith.constant dense<0.000000e+00> : vector<8x64xf32>
    %8 = tpu.matmul %6, %7, %cst {dimension_numbers = #tpu.dot_dimension_numbers<[1], [0], [0], [1], [0, 0, 1, 1], [], []>} : vector<8x32xf32>, vector<32x64xf32>, vector<8x64xf32> -> vector<8x64xf32>
    %c0_7 = arith.constant 0 : index
    %c0_8 = arith.constant 0 : index
    %9 = vector.load %arg6[%c0_7, %c0_8] : memref<1x64xf32, #tpu.memory_space<vmem>>, vector<1x64xf32>
    %10 = vector.broadcast %9 : vector<1x64xf32> to vector<8x64xf32>
    %11 = arith.addf %8, %10 : vector<8x64xf32>
    %c0_9 = arith.constant 0 : index
    %c0_10 = arith.constant 0 : index
    %12 = vector.load %arg7[%c0_9, %c0_10] : memref<1x64xf32, #tpu.memory_space<vmem>>, vector<1x64xf32>
    %13 = vector.broadcast %12 : vector<1x64xf32> to vector<8x64xf32>
    %14 = arith.mulf %11, %13 : vector<8x64xf32>
    %c0_11 = arith.constant 0 : index
    %c0_12 = arith.constant 0 : index
    %15 = vector.load %arg8[%c0_11, %c0_12] : memref<1x64xf32, #tpu.memory_space<vmem>>, vector<1x64xf32>
    %16 = vector.broadcast %15 : vector<1x64xf32> to vector<8x64xf32>
    %17 = arith.addf %14, %16 : vector<8x64xf32>
    %cst_13 = arith.constant 0.000000e+00 : f32
    %18 = vector.broadcast %cst_13 : f32 to vector<8x64xf32>
    %19 = arith.maximumf %17, %18 : vector<8x64xf32>
    %c0_14 = arith.constant 0 : index
    %c0_15 = arith.constant 0 : index
    %20 = vector.load %arg9[%c0_14, %c0_15] : memref<64x32xf32, #tpu.memory_space<vmem>>, vector<64x32xf32>
    %cst_16 = arith.constant dense<0.000000e+00> : vector<8x32xf32>
    %21 = tpu.matmul %19, %20, %cst_16 {dimension_numbers = #tpu.dot_dimension_numbers<[1], [0], [0], [1], [0, 0, 1, 1], [], []>} : vector<8x64xf32>, vector<64x32xf32>, vector<8x32xf32> -> vector<8x32xf32>
    %c0_17 = arith.constant 0 : index
    %c0_18 = arith.constant 0 : index
    %22 = vector.load %arg10[%c0_17, %c0_18] : memref<1x32xf32, #tpu.memory_space<vmem>>, vector<1x32xf32>
    %23 = vector.broadcast %22 : vector<1x32xf32> to vector<8x32xf32>
    %24 = arith.addf %21, %23 : vector<8x32xf32>
    %c0_19 = arith.constant 0 : index
    %c0_20 = arith.constant 0 : index
    %25 = vector.load %arg11[%c0_19, %c0_20] : memref<1x32xf32, #tpu.memory_space<vmem>>, vector<1x32xf32>
    %26 = vector.broadcast %25 : vector<1x32xf32> to vector<8x32xf32>
    %27 = arith.mulf %24, %26 : vector<8x32xf32>
    %c0_21 = arith.constant 0 : index
    %c0_22 = arith.constant 0 : index
    %28 = vector.load %arg12[%c0_21, %c0_22] : memref<1x32xf32, #tpu.memory_space<vmem>>, vector<1x32xf32>
    %29 = vector.broadcast %28 : vector<1x32xf32> to vector<8x32xf32>
    %30 = arith.addf %27, %29 : vector<8x32xf32>
    %cst_23 = arith.constant 0.000000e+00 : f32
    %31 = vector.broadcast %cst_23 : f32 to vector<8x32xf32>
    %32 = arith.maximumf %30, %31 : vector<8x32xf32>
    %c0_24 = arith.constant 0 : index
    %c0_25 = arith.constant 0 : index
    %33 = vector.load %arg13[%c0_24, %c0_25] : memref<32x1xf32, #tpu.memory_space<vmem>>, vector<32x1xf32>
    %cst_26 = arith.constant dense<0.000000e+00> : vector<8x1xf32>
    %34 = tpu.matmul %32, %33, %cst_26 {dimension_numbers = #tpu.dot_dimension_numbers<[1], [0], [0], [1], [0, 0, 1, 1], [], []>} : vector<8x32xf32>, vector<32x1xf32>, vector<8x1xf32> -> vector<8x1xf32>
    %c0_27 = arith.constant 0 : index
    %c0_28 = arith.constant 0 : index
    %35 = vector.load %arg14[%c0_27, %c0_28] : memref<1x1xf32, #tpu.memory_space<vmem>>, vector<1x1xf32>
    %36 = vector.broadcast %35 : vector<1x1xf32> to vector<8x1xf32>
    %37 = arith.addf %34, %36 : vector<8x1xf32>
    %c0_29 = arith.constant 0 : index
    %c0_30 = arith.constant 0 : index
    %38 = vector.load %arg2[%c0_29, %c0_30] : memref<8x1xf32, #tpu.memory_space<vmem>>, vector<8x1xf32>
    %39 = arith.addf %37, %38 : vector<8x1xf32>
    %c0_31 = arith.constant 0 : index
    %c0_32 = arith.constant 0 : index
    %40 = vector.load %arg15[%c0_31, %c0_32] : memref<1x1xf32, #tpu.memory_space<vmem>>, vector<1x1xf32>
    %41 = vector.broadcast %40 : vector<1x1xf32> to vector<8x1xf32>
    %42 = arith.addf %39, %41 : vector<8x1xf32>
    %cst_33 = arith.constant 0.000000e+00 : f32
    %43 = vector.broadcast %cst_33 : f32 to vector<8x1xf32>
    %44 = arith.subf %43, %42 : vector<8x1xf32>
    %45 = math.exp %44 : vector<8x1xf32>
    %cst_34 = arith.constant 1.000000e+00 : f32
    %46 = vector.broadcast %cst_34 : f32 to vector<8x1xf32>
    %47 = arith.addf %46, %45 : vector<8x1xf32>
    %cst_35 = arith.constant 1.000000e+00 : f32
    %48 = vector.broadcast %cst_35 : f32 to vector<8x1xf32>
    %49 = arith.divf %48, %47 : vector<8x1xf32>
    %c0_36 = arith.constant 0 : index
    %c0_37 = arith.constant 0 : index
    %50 = vector.load %arg16[%c0_36, %c0_37] : memref<8x1xf32, #tpu.memory_space<vmem>>, vector<8x1xf32>
    tpu.vector_store %arg16[%c0_36, %c0_37], %49 {strides = array<i32>} : memref<8x1xf32, #tpu.memory_space<vmem>>, vector<8x1xf32>,
    return
  }
  func.func @transform_0(%arg0: i32) -> (i32, i32) {
    %c0_i32 = arith.constant 0 : i32
    %c0_i32_0 = arith.constant 0 : i32
    return %arg0, %c0_i32 : i32, i32
  }
  func.func @transform_1(%arg0: i32) -> (i32, i32) {
    %c0_i32 = arith.constant 0 : i32
    %c0_i32_0 = arith.constant 0 : i32
    return %arg0, %c0_i32 : i32, i32
  }
  func.func @transform_2(%arg0: i32) -> (i32, i32) {
    %c0_i32 = arith.constant 0 : i32
    %c0_i32_0 = arith.constant 0 : i32
    %c0_i32_1 = arith.constant 0 : i32
    return %c0_i32, %c0_i32_0 : i32, i32
  }
  func.func @transform_3(%arg0: i32) -> (i32, i32) {
    %c0_i32 = arith.constant 0 : i32
    %c0_i32_0 = arith.constant 0 : i32
    %c0_i32_1 = arith.constant 0 : i32
    return %c0_i32, %c0_i32_0 : i32, i32
  }
  func.func @transform_4(%arg0: i32) -> (i32, i32) {
    %c0_i32 = arith.constant 0 : i32
    %c0_i32_0 = arith.constant 0 : i32
    %c0_i32_1 = arith.constant 0 : i32
    return %c0_i32, %c0_i32_0 : i32, i32
  }
  func.func @transform_5(%arg0: i32) -> (i32, i32) {
    %c0_i32 = arith.constant 0 : i32
    %c0_i32_0 = arith.constant 0 : i32
    %c0_i32_1 = arith.constant 0 : i32
    return %c0_i32, %c0_i32_0 : i32, i32
  }
  func.func @transform_6(%arg0: i32) -> (i32, i32) {
    %c0_i32 = arith.constant 0 : i32
    %c0_i32_0 = arith.constant 0 : i32
    %c0_i32_1 = arith.constant 0 : i32
    return %c0_i32, %c0_i32_0 : i32, i32
  }
  func.func @transform_7(%arg0: i32) -> (i32, i32) {
    %c0_i32 = arith.constant 0 : i32
    %c0_i32_0 = arith.constant 0 : i32
    %c0_i32_1 = arith.constant 0 : i32
    return %c0_i32, %c0_i32_0 : i32, i32
  }
  func.func @transform_8(%arg0: i32) -> (i32, i32) {
    %c0_i32 = arith.constant 0 : i32
    %c0_i32_0 = arith.constant 0 : i32
    %c0_i32_1 = arith.constant 0 : i32
    return %c0_i32, %c0_i32_0 : i32, i32
  }
  func.func @transform_9(%arg0: i32) -> (i32, i32) {
    %c0_i32 = arith.constant 0 : i32
    %c0_i32_0 = arith.constant 0 : i32
    %c0_i32_1 = arith.constant 0 : i32
    return %c0_i32, %c0_i32_0 : i32, i32
  }
  func.func @transform_10(%arg0: i32) -> (i32, i32) {
    %c0_i32 = arith.constant 0 : i32
    %c0_i32_0 = arith.constant 0 : i32
    %c0_i32_1 = arith.constant 0 : i32
    return %c0_i32, %c0_i32_0 : i32, i32
  }
  func.func @transform_11(%arg0: i32) -> (i32, i32) {
    %c0_i32 = arith.constant 0 : i32
    %c0_i32_0 = arith.constant 0 : i32
    %c0_i32_1 = arith.constant 0 : i32
    return %c0_i32, %c0_i32_0 : i32, i32
  }
  func.func @transform_12(%arg0: i32) -> (i32, i32) {
    %c0_i32 = arith.constant 0 : i32
    %c0_i32_0 = arith.constant 0 : i32
    %c0_i32_1 = arith.constant 0 : i32
    return %c0_i32, %c0_i32_0 : i32, i32
  }
  func.func @transform_13(%arg0: i32) -> (i32, i32) {
    %c0_i32 = arith.constant 0 : i32
    %c0_i32_0 = arith.constant 0 : i32
    %c0_i32_1 = arith.constant 0 : i32
    return %c0_i32, %c0_i32_0 : i32, i32
  }
  func.func @transform_14(%arg0: i32) -> (i32, i32) {
    %c0_i32 = arith.constant 0 : i32
    %c0_i32_0 = arith.constant 0 : i32
    %c0_i32_1 = arith.constant 0 : i32
    return %c0_i32, %c0_i32_0 : i32, i32
  }
  func.func @transform_15(%arg0: i32) -> (i32, i32) {
    %c0_i32 = arith.constant 0 : i32
    %c0_i32_0 = arith.constant 0 : i32
    return %arg0, %c0_i32 : i32, i32
  }
}

module attributes {stable_mosaic.version = 11 : i64} {
  func.func @kernel(%arg0: i32, %arg1: memref<8x4xi32, #tpu.memory_space<smem>>, %arg2: memref<4xi32, #tpu.memory_space<smem>>, %arg3: memref<1x1x32xf32, #tpu.memory_space<vmem>>, %arg4: memref<1x1x32xf32, #tpu.memory_space<vmem>>, %arg5: memref<1x1x32xf32, #tpu.memory_space<vmem>>, %arg6: memref<1x1x32xf32, #tpu.memory_space<vmem>>, %arg7: memref<1x1x1xf32, #tpu.memory_space<vmem>>, %arg8: memref<1x1x1xf32, #tpu.memory_space<vmem>>, %arg9: memref<1x1x1xf32, #tpu.memory_space<vmem>>, %arg10: memref<1x1x1xf32, #tpu.memory_space<vmem>>, %arg11: memref<1x1x32xf32, #tpu.memory_space<vmem>>, %arg12: memref<1x1x1xf32, #tpu.memory_space<vmem>>) attributes {dimension_semantics = [#tpu.dimension_semantics<parallel>], iteration_bounds = array<i64: 8>, scalar_prefetch = 2 : i64, scratch_operands = 0 : i64, tpu.core_type = #tpu.core_type<tc>, window_params = [{transform_indices = @transform_0, window_bounds = array<i64: 1, 1, 32>}, {transform_indices = @transform_1, window_bounds = array<i64: 1, 1, 32>}, {transform_indices = @transform_2, window_bounds = array<i64: 1, 1, 32>}, {transform_indices = @transform_3, window_bounds = array<i64: 1, 1, 32>}, {transform_indices = @transform_4, window_bounds = array<i64: 1, 1, 1>}, {transform_indices = @transform_5, window_bounds = array<i64: 1, 1, 1>}, {transform_indices = @transform_6, window_bounds = array<i64: 1, 1, 1>}, {transform_indices = @transform_7, window_bounds = array<i64: 1, 1, 1>}, {transform_indices = @transform_8, window_bounds = array<i64: 1, 1, 32>}, {transform_indices = @transform_9, window_bounds = array<i64: 1, 1, 1>}]} {
    %cst = arith.constant 0.000000e+00 : f32
    %0 = vector.broadcast %cst : f32 to vector<1x32xf32>
    %cst_0 = arith.constant 0.000000e+00 : f32
    %1 = vector.broadcast %cst_0 : f32 to vector<1x32xf32>
    %c0 = arith.constant 0 : index
    %c0_1 = arith.constant 0 : index
    %c0_2 = arith.constant 0 : index
    %2 = vector.load %arg3[%c0, %c0_1, %c0_2] : memref<1x1x32xf32, #tpu.memory_space<vmem>>, vector<1x1x32xf32>
    %3 = vector.shape_cast %2 : vector<1x1x32xf32> to vector<1x32xf32>
    %4 = arith.addf %0, %3 : vector<1x32xf32>
    %5 = arith.mulf %3, %3 : vector<1x32xf32>
    %6 = arith.addf %1, %5 : vector<1x32xf32>
    %c0_3 = arith.constant 0 : index
    %c0_4 = arith.constant 0 : index
    %c0_5 = arith.constant 0 : index
    %7 = vector.load %arg4[%c0_3, %c0_4, %c0_5] : memref<1x1x32xf32, #tpu.memory_space<vmem>>, vector<1x1x32xf32>
    %8 = vector.shape_cast %7 : vector<1x1x32xf32> to vector<1x32xf32>
    %9 = arith.addf %4, %8 : vector<1x32xf32>
    %10 = arith.mulf %8, %8 : vector<1x32xf32>
    %11 = arith.addf %6, %10 : vector<1x32xf32>
    %c0_6 = arith.constant 0 : index
    %c0_7 = arith.constant 0 : index
    %c0_8 = arith.constant 0 : index
    %12 = vector.load %arg5[%c0_6, %c0_7, %c0_8] : memref<1x1x32xf32, #tpu.memory_space<vmem>>, vector<1x1x32xf32>
    %13 = vector.shape_cast %12 : vector<1x1x32xf32> to vector<1x32xf32>
    %14 = arith.addf %9, %13 : vector<1x32xf32>
    %15 = arith.mulf %13, %13 : vector<1x32xf32>
    %16 = arith.addf %11, %15 : vector<1x32xf32>
    %c0_9 = arith.constant 0 : index
    %c0_10 = arith.constant 0 : index
    %c0_11 = arith.constant 0 : index
    %17 = vector.load %arg6[%c0_9, %c0_10, %c0_11] : memref<1x1x32xf32, #tpu.memory_space<vmem>>, vector<1x1x32xf32>
    %18 = vector.shape_cast %17 : vector<1x1x32xf32> to vector<1x32xf32>
    %19 = arith.addf %14, %18 : vector<1x32xf32>
    %20 = arith.mulf %18, %18 : vector<1x32xf32>
    %21 = arith.addf %16, %20 : vector<1x32xf32>
    %22 = arith.mulf %19, %19 : vector<1x32xf32>
    %23 = arith.subf %22, %21 : vector<1x32xf32>
    %cst_12 = arith.constant 5.000000e-01 : f32
    %24 = vector.broadcast %cst_12 : f32 to vector<1x32xf32>
    %25 = arith.mulf %24, %23 : vector<1x32xf32>
    %c0_13 = arith.constant 0 : index
    %c0_14 = arith.constant 0 : index
    %c0_15 = arith.constant 0 : index
    %26 = vector.load %arg11[%c0_13, %c0_14, %c0_15] : memref<1x1x32xf32, #tpu.memory_space<vmem>>, vector<1x1x32xf32>
    %27 = vector.shape_cast %26 : vector<1x1x32xf32> to vector<1x32xf32>
    %28 = vector.shape_cast %25 : vector<1x32xf32> to vector<1x1x32xf32>
    tpu.vector_store %arg11[%c0_13, %c0_14, %c0_15], %28 {strides = array<i32>} : memref<1x1x32xf32, #tpu.memory_space<vmem>>, vector<1x1x32xf32>,
    %cst_16 = arith.constant 0.000000e+00 : f32
    %29 = vector.broadcast %cst_16 : f32 to vector<1x1xf32>
    %c0_17 = arith.constant 0 : index
    %c0_18 = arith.constant 0 : index
    %c0_19 = arith.constant 0 : index
    %30 = vector.load %arg7[%c0_17, %c0_18, %c0_19] : memref<1x1x1xf32, #tpu.memory_space<vmem>>, vector<1x1x1xf32>
    %31 = vector.shape_cast %30 : vector<1x1x1xf32> to vector<1x1xf32>
    %32 = arith.addf %29, %31 : vector<1x1xf32>
    %c0_20 = arith.constant 0 : index
    %c0_21 = arith.constant 0 : index
    %c0_22 = arith.constant 0 : index
    %33 = vector.load %arg8[%c0_20, %c0_21, %c0_22] : memref<1x1x1xf32, #tpu.memory_space<vmem>>, vector<1x1x1xf32>
    %34 = vector.shape_cast %33 : vector<1x1x1xf32> to vector<1x1xf32>
    %35 = arith.addf %32, %34 : vector<1x1xf32>
    %c0_23 = arith.constant 0 : index
    %c0_24 = arith.constant 0 : index
    %c0_25 = arith.constant 0 : index
    %36 = vector.load %arg9[%c0_23, %c0_24, %c0_25] : memref<1x1x1xf32, #tpu.memory_space<vmem>>, vector<1x1x1xf32>
    %37 = vector.shape_cast %36 : vector<1x1x1xf32> to vector<1x1xf32>
    %38 = arith.addf %35, %37 : vector<1x1xf32>
    %c0_26 = arith.constant 0 : index
    %c0_27 = arith.constant 0 : index
    %c0_28 = arith.constant 0 : index
    %39 = vector.load %arg10[%c0_26, %c0_27, %c0_28] : memref<1x1x1xf32, #tpu.memory_space<vmem>>, vector<1x1x1xf32>
    %40 = vector.shape_cast %39 : vector<1x1x1xf32> to vector<1x1xf32>
    %41 = arith.addf %38, %40 : vector<1x1xf32>
    %c0_29 = arith.constant 0 : index
    %c0_30 = arith.constant 0 : index
    %c0_31 = arith.constant 0 : index
    %42 = vector.load %arg12[%c0_29, %c0_30, %c0_31] : memref<1x1x1xf32, #tpu.memory_space<vmem>>, vector<1x1x1xf32>
    %43 = vector.shape_cast %42 : vector<1x1x1xf32> to vector<1x1xf32>
    %44 = vector.shape_cast %41 : vector<1x1xf32> to vector<1x1x1xf32>
    tpu.vector_store %arg12[%c0_29, %c0_30, %c0_31], %44 {strides = array<i32>} : memref<1x1x1xf32, #tpu.memory_space<vmem>>, vector<1x1x1xf32>,
    return
  }
  func.func @transform_0(%arg0: i32, %arg1: memref<8x4xi32, #tpu.memory_space<smem>>, %arg2: memref<4xi32, #tpu.memory_space<smem>>) -> (i32, i32, i32) {
    %0 = arith.index_cast %arg0 : i32 to index
    %c0 = arith.constant 0 : index
    %1 = memref.load %arg1[%0, %c0] : memref<8x4xi32, #tpu.memory_space<smem>>
    %c0_0 = arith.constant 0 : index
    %2 = memref.load %arg2[%c0_0] : memref<4xi32, #tpu.memory_space<smem>>
    %3 = arith.addi %1, %2 : i32
    %c0_i32 = arith.constant 0 : i32
    %4 = arith.maxsi %3, %c0_i32 : i32
    %c31_i32 = arith.constant 31 : i32
    %5 = arith.minsi %4, %c31_i32 : i32
    %c0_i32_1 = arith.constant 0 : i32
    %c0_i32_2 = arith.constant 0 : i32
    %c0_i32_3 = arith.constant 0 : i32
    return %5, %c0_i32_1, %c0_i32_2 : i32, i32, i32
  }
  func.func @transform_1(%arg0: i32, %arg1: memref<8x4xi32, #tpu.memory_space<smem>>, %arg2: memref<4xi32, #tpu.memory_space<smem>>) -> (i32, i32, i32) {
    %0 = arith.index_cast %arg0 : i32 to index
    %c1 = arith.constant 1 : index
    %1 = memref.load %arg1[%0, %c1] : memref<8x4xi32, #tpu.memory_space<smem>>
    %c1_0 = arith.constant 1 : index
    %2 = memref.load %arg2[%c1_0] : memref<4xi32, #tpu.memory_space<smem>>
    %3 = arith.addi %1, %2 : i32
    %c0_i32 = arith.constant 0 : i32
    %4 = arith.maxsi %3, %c0_i32 : i32
    %c31_i32 = arith.constant 31 : i32
    %5 = arith.minsi %4, %c31_i32 : i32
    %c0_i32_1 = arith.constant 0 : i32
    %c0_i32_2 = arith.constant 0 : i32
    %c0_i32_3 = arith.constant 0 : i32
    return %5, %c0_i32_1, %c0_i32_2 : i32, i32, i32
  }
  func.func @transform_2(%arg0: i32, %arg1: memref<8x4xi32, #tpu.memory_space<smem>>, %arg2: memref<4xi32, #tpu.memory_space<smem>>) -> (i32, i32, i32) {
    %0 = arith.index_cast %arg0 : i32 to index
    %c2 = arith.constant 2 : index
    %1 = memref.load %arg1[%0, %c2] : memref<8x4xi32, #tpu.memory_space<smem>>
    %c2_0 = arith.constant 2 : index
    %2 = memref.load %arg2[%c2_0] : memref<4xi32, #tpu.memory_space<smem>>
    %3 = arith.addi %1, %2 : i32
    %c0_i32 = arith.constant 0 : i32
    %4 = arith.maxsi %3, %c0_i32 : i32
    %c31_i32 = arith.constant 31 : i32
    %5 = arith.minsi %4, %c31_i32 : i32
    %c0_i32_1 = arith.constant 0 : i32
    %c0_i32_2 = arith.constant 0 : i32
    %c0_i32_3 = arith.constant 0 : i32
    return %5, %c0_i32_1, %c0_i32_2 : i32, i32, i32
  }
  func.func @transform_3(%arg0: i32, %arg1: memref<8x4xi32, #tpu.memory_space<smem>>, %arg2: memref<4xi32, #tpu.memory_space<smem>>) -> (i32, i32, i32) {
    %0 = arith.index_cast %arg0 : i32 to index
    %c3 = arith.constant 3 : index
    %1 = memref.load %arg1[%0, %c3] : memref<8x4xi32, #tpu.memory_space<smem>>
    %c3_0 = arith.constant 3 : index
    %2 = memref.load %arg2[%c3_0] : memref<4xi32, #tpu.memory_space<smem>>
    %3 = arith.addi %1, %2 : i32
    %c0_i32 = arith.constant 0 : i32
    %4 = arith.maxsi %3, %c0_i32 : i32
    %c31_i32 = arith.constant 31 : i32
    %5 = arith.minsi %4, %c31_i32 : i32
    %c0_i32_1 = arith.constant 0 : i32
    %c0_i32_2 = arith.constant 0 : i32
    %c0_i32_3 = arith.constant 0 : i32
    return %5, %c0_i32_1, %c0_i32_2 : i32, i32, i32
  }
  func.func @transform_4(%arg0: i32, %arg1: memref<8x4xi32, #tpu.memory_space<smem>>, %arg2: memref<4xi32, #tpu.memory_space<smem>>) -> (i32, i32, i32) {
    %0 = arith.index_cast %arg0 : i32 to index
    %c0 = arith.constant 0 : index
    %1 = memref.load %arg1[%0, %c0] : memref<8x4xi32, #tpu.memory_space<smem>>
    %c0_0 = arith.constant 0 : index
    %2 = memref.load %arg2[%c0_0] : memref<4xi32, #tpu.memory_space<smem>>
    %3 = arith.addi %1, %2 : i32
    %c0_i32 = arith.constant 0 : i32
    %4 = arith.maxsi %3, %c0_i32 : i32
    %c31_i32 = arith.constant 31 : i32
    %5 = arith.minsi %4, %c31_i32 : i32
    %c0_i32_1 = arith.constant 0 : i32
    %c0_i32_2 = arith.constant 0 : i32
    %c0_i32_3 = arith.constant 0 : i32
    return %5, %c0_i32_1, %c0_i32_2 : i32, i32, i32
  }
  func.func @transform_5(%arg0: i32, %arg1: memref<8x4xi32, #tpu.memory_space<smem>>, %arg2: memref<4xi32, #tpu.memory_space<smem>>) -> (i32, i32, i32) {
    %0 = arith.index_cast %arg0 : i32 to index
    %c1 = arith.constant 1 : index
    %1 = memref.load %arg1[%0, %c1] : memref<8x4xi32, #tpu.memory_space<smem>>
    %c1_0 = arith.constant 1 : index
    %2 = memref.load %arg2[%c1_0] : memref<4xi32, #tpu.memory_space<smem>>
    %3 = arith.addi %1, %2 : i32
    %c0_i32 = arith.constant 0 : i32
    %4 = arith.maxsi %3, %c0_i32 : i32
    %c31_i32 = arith.constant 31 : i32
    %5 = arith.minsi %4, %c31_i32 : i32
    %c0_i32_1 = arith.constant 0 : i32
    %c0_i32_2 = arith.constant 0 : i32
    %c0_i32_3 = arith.constant 0 : i32
    return %5, %c0_i32_1, %c0_i32_2 : i32, i32, i32
  }
  func.func @transform_6(%arg0: i32, %arg1: memref<8x4xi32, #tpu.memory_space<smem>>, %arg2: memref<4xi32, #tpu.memory_space<smem>>) -> (i32, i32, i32) {
    %0 = arith.index_cast %arg0 : i32 to index
    %c2 = arith.constant 2 : index
    %1 = memref.load %arg1[%0, %c2] : memref<8x4xi32, #tpu.memory_space<smem>>
    %c2_0 = arith.constant 2 : index
    %2 = memref.load %arg2[%c2_0] : memref<4xi32, #tpu.memory_space<smem>>
    %3 = arith.addi %1, %2 : i32
    %c0_i32 = arith.constant 0 : i32
    %4 = arith.maxsi %3, %c0_i32 : i32
    %c31_i32 = arith.constant 31 : i32
    %5 = arith.minsi %4, %c31_i32 : i32
    %c0_i32_1 = arith.constant 0 : i32
    %c0_i32_2 = arith.constant 0 : i32
    %c0_i32_3 = arith.constant 0 : i32
    return %5, %c0_i32_1, %c0_i32_2 : i32, i32, i32
  }
  func.func @transform_7(%arg0: i32, %arg1: memref<8x4xi32, #tpu.memory_space<smem>>, %arg2: memref<4xi32, #tpu.memory_space<smem>>) -> (i32, i32, i32) {
    %0 = arith.index_cast %arg0 : i32 to index
    %c3 = arith.constant 3 : index
    %1 = memref.load %arg1[%0, %c3] : memref<8x4xi32, #tpu.memory_space<smem>>
    %c3_0 = arith.constant 3 : index
    %2 = memref.load %arg2[%c3_0] : memref<4xi32, #tpu.memory_space<smem>>
    %3 = arith.addi %1, %2 : i32
    %c0_i32 = arith.constant 0 : i32
    %4 = arith.maxsi %3, %c0_i32 : i32
    %c31_i32 = arith.constant 31 : i32
    %5 = arith.minsi %4, %c31_i32 : i32
    %c0_i32_1 = arith.constant 0 : i32
    %c0_i32_2 = arith.constant 0 : i32
    %c0_i32_3 = arith.constant 0 : i32
    return %5, %c0_i32_1, %c0_i32_2 : i32, i32, i32
  }
  func.func @transform_8(%arg0: i32, %arg1: memref<8x4xi32, #tpu.memory_space<smem>>, %arg2: memref<4xi32, #tpu.memory_space<smem>>) -> (i32, i32, i32) {
    %c0_i32 = arith.constant 0 : i32
    %c0_i32_0 = arith.constant 0 : i32
    %c0_i32_1 = arith.constant 0 : i32
    return %arg0, %c0_i32, %c0_i32_0 : i32, i32, i32
  }
  func.func @transform_9(%arg0: i32, %arg1: memref<8x4xi32, #tpu.memory_space<smem>>, %arg2: memref<4xi32, #tpu.memory_space<smem>>) -> (i32, i32, i32) {
    %c0_i32 = arith.constant 0 : i32
    %c0_i32_0 = arith.constant 0 : i32
    %c0_i32_1 = arith.constant 0 : i32
    return %arg0, %c0_i32, %c0_i32_0 : i32, i32, i32
  }
}

</mosaic_0001>

<bundles_post_ra>
// kernel: nfm_forward.3
= control target key start
LH: loop header
LB: loop body
LE: loop exit
PB: predicated region body
PF: predicated region fallthrough
CT: control target
= control target key end

     0   :  { %vm73_vm0 = vcmask 261120   ;;  %vm120_vm1 = vcmask 523264   ;;  %vm212_vm5 = vcmask 7168   ;;  %s404_s4 = inlined_call_operand.vmem [shape: f32[32,64], index: 4, kind: input, shape index: {}]   ;;  %s405_s0 = inlined_call_operand.vmem [shape: f32[8,32], index: 0, kind: input, shape index: {}]   ;;  %s406_s2 = inlined_call_operand.vmem [shape: f32[1,32], index: 2, kind: input, shape index: {}]   ;;  %s407_s3 = inlined_call_operand.vmem [shape: f32[1,32], index: 3, kind: input, shape index: {}]   ;;  %s408_s8 = inlined_call_operand.vmem [shape: f32[64,32], index: 8, kind: input, shape index: {}]   ;;  %s409_s5 = inlined_call_operand.vmem [shape: f32[1,64], index: 5, kind: input, shape index: {}]   ;;  %s410_s6 = inlined_call_operand.vmem [shape: f32[1,64], index: 6, kind: input, shape index: {}]   ;;  %s411_s7 = inlined_call_operand.vmem [shape: f32[1,64], index: 7, kind: input, shape index: {}]   ;;  %s412_s9 = inlined_call_operand.vmem [shape: f32[1,32], index: 9, kind: input, shape index: {}]   ;;  %s413_s10 = inlined_call_operand.vmem [shape: f32[1,32], index: 10, kind: input, shape index: {}]   ;;  %s414_s11 = inlined_call_operand.vmem [shape: f32[1,32], index: 11, kind: input, shape index: {}]   ;;  %s415_s12 = inlined_call_operand.vmem [shape: f32[32,1], index: 12, kind: input, shape index: {}]   ;;  %s416_s13 = inlined_call_operand.<no memory space> [shape: f32[1,1], index: 13, kind: input, shape index: {}]   ;;  %s417_s14 = inlined_call_operand.<no memory space> [shape: f32[1,1], index: 14, kind: input, shape index: {}]   ;;  %s418_s1 = inlined_call_operand.vmem [shape: f32[8,1], index: 1, kind: input, shape index: {}]   ;;  %s419_s15 = inlined_call_operand.vmem [shape: f32[8,1], index: 15, kind: output, shape index: {}]  }
   0x1   :  { %v68_v0 = vld [vmem:[%s404_s4 + $0x18] sm:$0xff]  ;;  %v67_v1 = vld [vmem:[%s404_s4 + $0x10] sm:$0xff]  ;;  %v66_v2 = vld [vmem:[%s404_s4 + $0x8] sm:$0xff]  ;;  %v20_v29 = vstv %s416_s13 }
   0x2   :  { %89 = vmatpush.msra.mxu0 %v68_v0  ;;  %v54_v3 = vld [vmem:[%s405_s0] sm:$0xff]  ;;  %v115_v6 = vld [vmem:[%s408_s8 + $0x38] sm:$0xff]  ;;  %v114_v7 = vld [vmem:[%s408_s8 + $0x30] sm:$0xff]  ;;  %v22_v30 = vstv %s417_s14  ;;  %21 = vst [vmem:[#allocation2] sm:$0x1] %v20_v29 }
   0x3   :  { %v221_v4 = vld [vmem:[%s406_s2] ss:$0 sm:$0xff]  ;;  %132 = vmatpush.msra.mxu1 %v115_v6  ;;  %v113_v10 = vld [vmem:[%s408_s8 + $0x28] sm:$0xff]  ;;  %v111_v13 = vld [vmem:[%s408_s8 + $0x18] sm:$0xff]  ;;  %23 = vst [vmem:[#allocation3] sm:$0x1] %v22_v30 }
   0x4   :  { %v222_v5 = vld [vmem:[%s407_s3] ss:$0 sm:$0xff]  ;;  %90 = vmatpush.msra.mxu0 %v67_v1  ;;  %v59_v9 = vmul.f32 %v221_v4, %v54_v3  ;;  %v110_v14 = vld [vmem:[%s408_s8 + $0x10] sm:$0xff]  ;;  %v109_v15 = vld [vmem:[%s408_s8 + $0x8] sm:$0xff] }
   0x5   :  { %v65_v8 = vld [vmem:[%s404_s4] sm:$0xff]  ;;  %133 = vmatpush.msra.mxu1 %v114_v7  ;;  %v158_v25 = vld [vmem:[%s415_s12 + $0x18] sm:$0xff]  ;;  %v157_v26 = vld [vmem:[%s415_s12 + $0x10] sm:$0xff] }
   0x6   :  { %91 = vmatpush.msra.mxu0 %v66_v2  ;;  %v64_v11 = vadd.f32 %v222_v5, %v59_v9  ;;  %v112_v12 = vld [vmem:[%s408_s8 + $0x20] sm:$0xff]  ;;  %178 = vmatpush.msra.mxu2 %v158_v25  ;;  %v156_v27 = vld [vmem:[%s415_s12 + $0x8] sm:$0xff] }
   0x7   :  { %134 = vmatpush.msra.mxu1 %v113_v10  ;;  %v108_v16 = vld [vmem:[%s408_s8] sm:$0xff] }
   0x8   :  { %92 = vmatpush.msra.mxu0 %v65_v8  ;;  %v223_v17 = vld [vmem:[%s409_s5] ss:$0 sm:$0xff]  ;;  %179 = vmatpush.msra.mxu2 %v157_v26 }
   0x9   :  { %218 = vmatmul.msk.f32.vlgmr.msra.gmra.mxu0 %vm73_vm0, %v64_v11  ;;  %135 = vmatpush.msra.mxu1 %v112_v12  ;;  %v224_v18 = vld [vmem:[%s410_s6] ss:$0 sm:$0xff] }
   0xa   :  { %v225_v21 = vld [vmem:[%s411_s7] ss:$0 sm:$0xff]  ;;  %180 = vmatpush.msra.mxu2 %v156_v27  ;;  %v230_v43 = vld [vmem:[#allocation3] ss:$0 sm:$0xff] }
   0xb   :  { %136 = vmatpush.msra.mxu1 %v111_v13  ;;  %v155_v28 = vld [vmem:[%s415_s12] sm:$0xff] }
   0xc   :  { %181 = vmatpush.msra.mxu2 %v155_v28  ;;  %v226_v31 = vld [vmem:[%s412_s9] ss:$0 sm:$0xff] }
   0xd   :  { %137 = vmatpush.msra.mxu1 %v110_v14  ;;  %v227_v32 = vld [vmem:[%s413_s10] ss:$0 sm:$0xff] }
   0xe   :  { %v228_v35 = vld [vmem:[%s414_s11] ss:$0 sm:$0xff] }
   0xf   :  { %138 = vmatpush.msra.mxu1 %v109_v15  ;;  %v229_v39 = vld [vmem:[#allocation2] ss:$0 sm:$0xff] }
  0x10   :  { %v186_v41 = vld [vmem:[%s418_s1] sm:$0xff] }
  0x11   :  { %139 = vmatpush.msra.mxu1 %v108_v16 }
  0x86   :  { %v94_v19 = vpop.f32.mrf.mxu0 }
  0x87   :  { %v95_v20 = vadd.f32 %v223_v17, %v94_v19 }
  0x89   :  { %v101_v22 = vmul.f32 %v224_v18, %v95_v20 }
  0x8b   :  { %v106_v23 = vadd.f32 %v225_v21, %v101_v22 }
  0x8d   :  { %v107_v24 = vmax.f32 %v106_v23, 0.0 }
  0x8f   :  { %219 = vmatmul.msk.f32.vlgmr.msra.gmra.mxu1 %vm120_vm1, %v107_v24 }
 0x10c   :  { %v141_v33 = vpop.f32.mrf.mxu1 }
 0x10d   :  { %v142_v34 = vadd.f32 %v226_v31, %v141_v33 }
 0x10f   :  { %v148_v36 = vmul.f32 %v227_v32, %v142_v34 }
 0x111   :  { %v153_v37 = vadd.f32 %v228_v35, %v148_v36 }
 0x113   :  { %v154_v38 = vmax.f32 %v153_v37, 0.0 }
 0x115   :  { %220 = vmatmul.msk.f32.vlgmr.msra.gmra.mxu2 %vm73_vm0, %v154_v38 }
 0x198   :  { %v183_v40 = vpop.f32.mrf.mxu2 }
 0x199   :  { %v184_v42 = vadd.f32 %v229_v39, %v183_v40 }
 0x19b   :  { %v187_v44 = vadd.f32 %v186_v41, %v184_v42 }
 0x19d   :  { %v192_v45 = vadd.f32 %v230_v43, %v187_v44 }
 0x19f   :  { %v193_v46 = vsub.f32 0.0, %v192_v45 }
 0x1a1   :  { %v194_v47 = vmul.f32 1.442695, %v193_v46 }
 0x1a3   :  { %231 = vpow2.f32 %v194_v47 }
 0x1a9   :  { %v232_v48 = vpop.eup %231 }
 0x1aa   :  { %v196_v49 = vadd.f32 1.0, %v232_v48 }
 0x1ac   :  { %233 = vrcp.f32 %v196_v49  ;;  %v208_v53 = vand.u32 2147483648, %v196_v49  ;;  %v206_v55 = vand.u32 2147483647, %v196_v49  ;;  %vm202_vm3 = vweird.f32 %v196_v49 }
 0x1ae   :  { %v209_v57 = vor.u32 1.1754944e-38, %v208_v53  ;;  %vm207_vm6 = vcmp.eq.f32.partialorder %v206_v55, 8.507059e+37 }
 0x1b2   :  { %v234_v50 = vpop.eup %233 }
 0x1b3   :  { %v198_v51 = vmul.f32 %v234_v50, %v196_v49  ;;  %vm203_vm2 = vweird.f32 %v234_v50 }
 0x1b4   :  { %vm204_vm4 = vmor %vm202_vm3, %vm203_vm2 }
 0x1b5   :  { %v199_v52 = vsub.f32 1.0, %v198_v51 }
 0x1b7   :  { %v200_v54 = vmul.f32 %v234_v50, %v199_v52 }
 0x1b9   :  { %v201_v56 = vadd.f32 %v234_v50, %v200_v54 }
 0x1bb   :  { %v205_v58 = vsel %vm204_vm4, %v234_v50, %v201_v56 }
 0x1bc   :  { %v210_v59 = vsel %vm207_vm6, %v209_v57, %v205_v58 }
 0x1bd   :  { %213 = vst.msk [vmem:[%s419_s15] sm:$0xff] %vm212_vm5, %v210_v59 }

// kernel: nfm_forward.2
= control target key start
LH: loop header
LB: loop body
LE: loop exit
PB: predicated region body
PF: predicated region fallthrough
CT: control target
= control target key end

     0   :  { %s1375_s23 = smov [#allocation3]   ;;  %s1376_s24 = smov [#allocation4]   ;;  %s1530_s0 = inlined_call_operand.vmem [shape: s32[8,4], index: 0, kind: input, shape index: {}]   ;;  %s1531_s2 = inlined_call_operand.vmem [shape: f32[32,1,32], index: 2, kind: input, shape index: {}, may-alias: {2,3,4,5}]   ;;  %s1532_s3 = inlined_call_operand.vmem [shape: f32[32,1,32], index: 3, kind: input, shape index: {}, may-alias: {2,3,4,5}]   ;;  %s1533_s4 = inlined_call_operand.vmem [shape: f32[32,1,32], index: 4, kind: input, shape index: {}, may-alias: {2,3,4,5}]   ;;  %s1534_s5 = inlined_call_operand.vmem [shape: f32[32,1,32], index: 5, kind: input, shape index: {}, may-alias: {2,3,4,5}]   ;;  %s1535_s6 = inlined_call_operand.vmem [shape: f32[32,1,1], index: 6, kind: input, shape index: {}, may-alias: {6,7,8,9}]   ;;  %s1536_s7 = inlined_call_operand.vmem [shape: f32[32,1,1], index: 7, kind: input, shape index: {}, may-alias: {6,7,8,9}]   ;;  %s1537_s8 = inlined_call_operand.vmem [shape: f32[32,1,1], index: 8, kind: input, shape index: {}, may-alias: {6,7,8,9}]   ;;  %s1538_s9 = inlined_call_operand.vmem [shape: f32[32,1,1], index: 9, kind: input, shape index: {}, may-alias: {6,7,8,9}]   ;;  %s1539_s10 = inlined_call_operand.vmem [shape: f32[8,1,32], index: 10, kind: output, shape index: {0}]   ;;  %s1540_s11 = inlined_call_operand.vmem [shape: f32[8,1,1], index: 11, kind: output, shape index: {1}]   ;;  %s1541_s1 = inlined_call_operand.vmem [shape: s32[4], index: 1, kind: input, shape index: {}]  }
   0x1   :  { %s18_s19 = sshll.u32 %s1530_s0, 4  ;;  %s23_s22 = sshll.u32 %s1541_s1, 4  ;;  %s19_s19 = int_to_ptr.vmem [resolvable:$true] %s18_s19  ;;  %s24_s22 = int_to_ptr.vmem [resolvable:$true] %s23_s22 }
   0x2   :  { %21 = dma.vmem_to_smem %s19_s19, 128, %s1375_s23, [#allocation2] }
   0x3   :  { %26 = dma.vmem_to_smem %s24_s22, 16, %s1376_s24, [#allocation2] }
   0x4   :  { %1369 = dma.done.wait [#allocation2], 144 }
   0x5   :  { %1370 = vsyncadd [#allocation2], 4294967152 }
   0x6   :  { %29 = sfence }
   0x7   :  { %s1443_s25 = smov 0  }
   0x8 LB: > { %s1449_s0 = sadd.s32 4294967295, %s1373_s25   ;;  %p1210_p0 = scmp.ge.s32.totalorder %s1373_s25, 1  ;;  %s1373_s25 = sphi %s1443_s25, %s35_s25  }
   0x9   : > { %p639_p1 = scmp.lt.s32.totalorder %s1373_s25, 9 }
   0xb   : > { %p640_p2 = pnand %p1210_p0, %p639_p1 }
   0xc   : > { %s1454_s1 = sshll.u32 (!%p640_p2), %s1449_s0, 7  ;;  %s1456_s26 = sld [smem:[#allocation4]] (!%p640_p2) }
   0xd   : > { %643 = sbr.rel (%p640_p2) target bundleno = 63 (0x3f), region = 52  ;;  %s766_s27 = sld [smem:[#allocation3 + %s1454_s1]] (!%p640_p2) }
   0xe   : > { %s785_s28 = sadd.s32 (!%p640_p2), 1, %s1454_s1  ;;  %s1543_s30 = sadd.s32 (!%p640_p2), 2, %s1454_s1 }
   0xf   : > { %s786_s29 = sld [smem:[#allocation3 + %s785_s28]] (!%p640_p2)  ;;  %s1542_s13 = sadd.s32 (!%p640_p2), 3, %s1454_s1 }
  0x10   : > { %s1463_s12 = sld [smem:[#allocation4 + $0x1]] (!%p640_p2)  ;;  %p929_p3 = scmp.lt.s32.totalorder (!%p640_p2), %s1449_s0, 7 }
  0x11   : > { %s807_s14 = sld [smem:[#allocation3 + %s1543_s30]] (!%p640_p2)  ;;  %s1544_s22 = sadd.s32 (!%p640_p2), 2, %s1454_s1 }
  0x12   : > { %s1468_s15 = sld [smem:[#allocation4 + $0x2]]  ;;  %s1569_s0 = smov (!%p929_p3, %s1449_s0), 7  ;;  %vm954_vm0 = vcmask 253952   ;;  %vm964_vm1 = vcmask 0  }
  0x13   : > { %s828_s16 = sld [smem:[#allocation3 + %s1542_s13]]  ;;  %s768_s17 = sadd.s32 %s1456_s26, %s766_s27 }
  0x14   : > { %s1474_s18 = sld [smem:[#allocation4 + $0x3]]  ;;  %p769_p4 = scmp.gt.s32.totalorder %s768_s17, 0 }
  0x15   : > { %p1212_p5 = scmp.lt.s32.totalorder %s768_s17, 31  ;;  %s848_s20 = sld [smem:[#allocation3 + %s1454_s1]] }
  0x16   : > { %s788_s19 = sadd.s32 %s1463_s12, %s786_s29  ;;  %s1547_s17 = smov (!%p769_p4, %s768_s17), 0 }
  0x17   : > { %p789_p6 = scmp.gt.s32.totalorder %s788_s19, 0  ;;  %p1219_p7 = scmp.lt.s32.totalorder %s788_s19, 31 }
  0x18   : > { %s1549_s17 = smov (!%p1212_p5, %s1547_s17), 31  ;;  %s809_s21 = sadd.s32 %s1468_s15, %s807_s14 }
  0x19   : > { %s1551_s19 = smov (!%p789_p6, %s788_s19), 0  ;;  %p773_p8 = scmp.lt.s32.totalorder %s1549_s17, 31 }
  0x1a   : > { %s1553_s19 = smov (!%p1219_p7, %s1551_s19), 31  ;;  %p810_p10 = scmp.gt.s32.totalorder %s809_s21, 0 }
  0x1b   : > { %s1555_s17 = smov (!%p773_p8, %s1549_s17), 31  ;;  %p793_p9 = scmp.lt.s32.totalorder %s1553_s19, 31 }
  0x1c   : > { %s775_s24 = scalar_lea.vmem %s1531_s2, %s1555_s17  ;;  %p1226_p11 = scmp.lt.s32.totalorder %s809_s21, 31 }
  0x1d   : > { %s1557_s19 = smov (!%p793_p9, %s1553_s19), 31  ;;  %s1559_s21 = smov (!%p810_p10, %s809_s21), 0  ;;  %v935_v0 = vld [vmem:[%s775_s24] sm:$0x1] }
  0x1e   : > { %s795_s13 = scalar_lea.vmem %s1532_s3, %s1557_s19  ;;  %s830_s30 = sadd.s32 %s1474_s18, %s828_s16  ;;  %v937_v2 = vmul.f32 %v935_v0, %v935_v0 }
  0x1f   : > { %s1561_s21 = smov (!%p1226_p11, %s1559_s21), 31  ;;  %v939_v1 = vld [vmem:[%s795_s13] sm:$0x1]  ;;  %p831_p12 = scmp.gt.s32.totalorder %s830_s30, 0 }
  0x20   : > { %p1233_p13 = scmp.lt.s32.totalorder %s830_s30, 31  ;;  %p814_p0 = scmp.lt.s32.totalorder %s1561_s21, 31  ;;  %v941_v3 = vmul.f32 %v939_v1, %v939_v1  ;;  %v940_v4 = vadd.f32 %v939_v1, %v935_v0 }
  0x21   : > { %s850_s14 = sadd.s32 %s848_s20, %s1456_s26  ;;  %s1563_s30 = smov (!%p831_p12, %s830_s30), 0 }
  0x22   : > { %s1565_s21 = smov (!%p814_p0, %s1561_s21), 31  ;;  %s1567_s30 = smov (!%p1233_p13, %s1563_s30), 31  ;;  %v942_v5 = vadd.f32 %v941_v3, %v937_v2 }
  0x23   : > { %s816_s16 = scalar_lea.vmem %s1533_s4, %s1565_s21  ;;  %p835_p1 = scmp.lt.s32.totalorder %s1567_s30, 31 }
  0x24   : > { %v943_v6 = vld [vmem:[%s816_s16] sm:$0x1]  ;;  %p851_p2 = scmp.gt.s32.totalorder %s850_s14, 0  ;;  %p1239_p4 = scmp.lt.s32.totalorder %s850_s14, 31 }
  0x25   : > { %v945_v7 = vmul.f32 %v943_v6, %v943_v6  ;;  %s1571_s30 = smov (!%p835_p1, %s1567_s30), 31  ;;  %v944_v8 = vadd.f32 %v943_v6, %v940_v4  ;;  %s868_s26 = sld [smem:[#allocation3 + %s785_s28]] }
  0x26   : > { %s837_s21 = scalar_lea.vmem %s1534_s5, %s1571_s30  ;;  %s889_s23 = sld [smem:[#allocation3 + %s1544_s22]] }
  0x27   : > { %v946_v9 = vadd.f32 %v945_v7, %v942_v5  ;;  %v947_v10 = vld [vmem:[%s837_s21] sm:$0x1]  ;;  %s1573_s14 = smov (!%p851_p2, %s850_s14), 0  ;;  %s931_s29 = scalar_lea.vmem %s1539_s10, %s1569_s0 }
  0x28   : > { %v948_v11 = vadd.f32 %v947_v10, %v944_v8  ;;  %v949_v12 = vmul.f32 %v947_v10, %v947_v10  ;;  %s1575_s14 = smov (!%p1239_p4, %s1573_s14), 31  ;;  %s1545_s28 = sadd.s32 3, %s1454_s1 }
  0x29   : > { %s910_s17 = sld [smem:[#allocation3 + %s1545_s28]]  ;;  %p855_p3 = scmp.lt.s32.totalorder %s1575_s14, 31 }
  0x2a   : > { %v950_v13 = vadd.f32 %v949_v12, %v946_v9  ;;  %v951_v14 = vmul.f32 %v948_v11, %v948_v11  ;;  %s934_s28 = scalar_lea.vmem %s1540_s11, %s1569_s0 }
  0x2b   : > { %s870_s30 = sadd.s32 %s1463_s12, %s868_s26  ;;  %s1577_s14 = smov (!%p855_p3, %s1575_s14), 31 }
  0x2c   : > { %v952_v15 = vsub.f32 %v951_v14, %v950_v13  ;;  %p871_p5 = scmp.gt.s32.totalorder %s870_s30, 0  ;;  %p1246_p6 = scmp.lt.s32.totalorder %s870_s30, 31 }
  0x2d   : > { %s857_s13 = scalar_lea.vmem %s1535_s6, %s1577_s14  ;;  %s891_s20 = sadd.s32 %s1468_s15, %s889_s23 }
  0x2e   : > { %v953_v16 = vmul.f32 0.5, %v952_v15  ;;  %s1579_s30 = smov (!%p871_p5, %s870_s30), 0  ;;  %p892_p7 = scmp.gt.s32.totalorder %s891_s20, 0  ;;  %v956_v17 = vld [vmem:[%s857_s13] sm:$0x1] }
  0x2f   : > { %s1581_s30 = smov (!%p1246_p6, %s1579_s30), 31  ;;  %p1253_p8 = scmp.lt.s32.totalorder %s891_s20, 31 }
  0x30   : > { %955 = vst.msk [vmem:[%s931_s29] sm:$0x1] %vm954_vm0, %v953_v16  ;;  %p875_p9 = scmp.lt.s32.totalorder %s1581_s30, 31  ;;  %s912_s1 = sadd.s32 %s1474_s18, %s910_s17 }
  0x31   : > { %s1583_s20 = smov (!%p892_p7, %s891_s20), 0  ;;  %p913_p10 = scmp.gt.s32.totalorder %s912_s1, 0 }
  0x32   : > { %s1585_s30 = smov (!%p875_p9, %s1581_s30), 31  ;;  %s1587_s20 = smov (!%p1253_p8, %s1583_s20), 31 }
  0x33   : > { %s877_s21 = scalar_lea.vmem %s1536_s7, %s1585_s30  ;;  %p896_p11 = scmp.lt.s32.totalorder %s1587_s20, 31 }
  0x34   : > { %p1260_p12 = scmp.lt.s32.totalorder %s912_s1, 31  ;;  %v958_v18 = vld [vmem:[%s877_s21] sm:$0x1]  ;;  %s1589_s1 = smov (!%p913_p10, %s912_s1), 0 }
  0x35   : > { %s1591_s20 = smov (!%p896_p11, %s1587_s20), 31  ;;  %v959_v19 = vadd.f32 %v958_v18, %v956_v17 }
  0x36   : > { %s1593_s1 = smov (!%p1260_p12, %s1589_s1), 31  ;;  %s898_s18 = scalar_lea.vmem %s1537_s8, %s1591_s20 }
  0x37   : > { %p917_p13 = scmp.lt.s32.totalorder %s1593_s1, 31  ;;  %v960_v20 = vld [vmem:[%s898_s18] sm:$0x1] }
  0x38   : > { %v961_v21 = vadd.f32 %v960_v20, %v959_v19 }
  0x39   : > { %s1595_s1 = smov (!%p917_p13, %s1593_s1), 31 }
  0x3a   : > { %s919_s24 = scalar_lea.vmem %s1538_s9, %s1595_s1 }
  0x3b   : > { %v962_v22 = vld [vmem:[%s919_s24] sm:$0x1] }
  0x3c   : > { %v963_v23 = vadd.f32 %v962_v22, %v961_v21 }
  0x3e   : > { %965 = vst.msk [vmem:[%s934_s28] sm:$0x1] %vm964_vm1, %v963_v23 }
  0x3f PF: > { %s35_s25 = sadd.s32 1, %s1373_s25  }
  0x40   : > { %p32_p0 = scmp.ge.s32.totalorder %s35_s25, 10  }
  0x42   :  { %34 = sbr.rel (!%p32_p0) target bundleno = 8 (0x8), region = 115 }

</bundles_post_ra>
